<compile_context>
chip_gen: v5e
topology: v5e:2x2
jax: 0.10.0
libtpu: 0.0.40
codegen_flags: <defaults>
</compile_context>

<pallas_src>
import jax
import jax.numpy as jnp
from jax.experimental import pallas as pl
from jax.experimental.pallas import tpu as pltpu

LANE = 128           # TPU lane width; last dim of every tile
MAX_ROW_TILE = 1024  # 1024 x 128 x 4B = 512 KiB per f32 tile (0.25-1 MiB sweet spot)


def _conv1x1_prelu_kernel(params_ref, x_ref, o_ref):
    # params_ref lives in SMEM: [w, b, a]
    w = params_ref[0]
    b = params_ref[1]
    a = params_ref[2]
    # Single fused load -> mul/add -> select -> store chain (no temporaries),
    # keeps the lone vector-store slot free on v5e and stays on the HBM roofline.
    y = x_ref[...] * w + b
    o_ref[...] = jnp.where(y > 0.0, y, a * y).astype(o_ref.dtype)


def _round_up(n, m):
    return ((n + m - 1) // m) * m


def conv1d_prelu(x_ncl, weight, bias, prelu_a):
    """y = PReLU(Conv1d(1,1,1)(x)).  x_ncl: (N, 1, L). Returns (N, 1, L)."""
    N, C, L = x_ncl.shape
    assert C == 1
    dtype = x_ncl.dtype
    total = N * C * L

    # Lane-dense layout: flatten and re-chunk into (rows, 128) so stores are
    # full-width regardless of L; pad rows up to the row-tile size.
    rows = pl.cdiv(total, LANE)
    tm = min(MAX_ROW_TILE, _round_up(rows, 8))   # multiple of 8 sublanes
    rows_padded = _round_up(rows, tm)
    padded_total = rows_padded * LANE

    flat = x_ncl.reshape(-1)
    if padded_total != total:
        flat = jnp.pad(flat, (0, padded_total - total))
    x2d = flat.reshape(rows_padded, LANE)

    params = jnp.stack(
        [weight.reshape(()), bias.reshape(()), prelu_a.reshape(())]
    ).astype(jnp.float32)

    num_tiles = rows_padded // tm
    grid_spec = pltpu.PrefetchScalarGridSpec(
        num_scalar_prefetch=1,                    # params -> SMEM
        grid=(num_tiles,),
        in_specs=[pl.BlockSpec((tm, LANE), lambda i, params_ref: (i, 0))],
        out_specs=pl.BlockSpec((tm, LANE), lambda i, params_ref: (i, 0)),
    )

    itemsize = jnp.dtype(dtype).itemsize
    out2d = pl.pallas_call(
        _conv1x1_prelu_kernel,
        out_shape=jax.ShapeDtypeStruct((rows_padded, LANE), dtype),
        grid_spec=grid_spec,
        compiler_params=pltpu.CompilerParams(
            # Row tiles are independent -> shard across both TCs on v7x
            # (no-op on single-TC v5e/v6e).
            dimension_semantics=("parallel",),
        ),
        cost_estimate=pl.CostEstimate(
            flops=3 * padded_total,
            transcendentals=0,
            bytes_accessed=2 * padded_total * itemsize,
        ),
    )(params, x2d)

    out_flat = out2d.reshape(-1)
    if padded_total != total:
        out_flat = out_flat[:total]
    return out_flat.reshape(N, C, L)
    # TODO(synk): if this op sits inside a larger model, fuse the affine+PReLU
    # into the producing/consuming kernel instead of a standalone HBM round trip.


if __name__ == "__main__":
    key = jax.random.PRNGKey(0)
    k_x, k_w, k_b = jax.random.split(key, 3)

    N, C, L = 2, 1, 128
    x = jax.random.normal(k_x, (N, C, L), dtype=jnp.float32)

    # Parameters per nn.Conv1d(1,1,1) and nn.PReLU():
    #   conv weight (1,1,1), conv bias (1,), PReLU a (1,) default 0.25
    weight = jax.random.uniform(k_w, (1, 1, 1), minval=-1.0, maxval=1.0, dtype=jnp.float32)
    bias = jax.random.uniform(k_b, (1,), minval=-1.0, maxval=1.0, dtype=jnp.float32)
    prelu_a = jnp.array([0.25], dtype=jnp.float32)

    out = conv1d_prelu(x, weight, bias, prelu_a)
    out = jax.block_until_ready(out)

    # Reference check in plain JAX
    y_ref = x * weight.reshape(()) + bias.reshape(())
    ref = jnp.where(y_ref > 0, y_ref, prelu_a.reshape(()) * y_ref)
    assert out.shape == (N, C, L)
    assert out.dtype == x.dtype
    assert jnp.allclose(out, ref, atol=1e-6), "mismatch vs reference"

    print("KERNEL_OK")
</pallas_src>

<mosaic_0001>
module attributes {stable_mosaic.version = 11 : i64} {
  func.func @_conv1x1_prelu_kernel(%arg0: i32, %arg1: memref<3xf32, #tpu.memory_space<smem>>, %arg2: memref<8x128xf32, #tpu.memory_space<vmem>>, %arg3: memref<8x128xf32, #tpu.memory_space<vmem>>) attributes {dimension_semantics = [#tpu.dimension_semantics<parallel>], iteration_bounds = array<i64: 1>, scalar_prefetch = 1 : i64, scratch_operands = 0 : i64, tpu.core_type = #tpu.core_type<tc>, window_params = [{transform_indices = @transform_0, window_bounds = array<i64: 8, 128>}, {transform_indices = @transform_1, window_bounds = array<i64: 8, 128>}]} {
    %c0 = arith.constant 0 : index
    %0 = memref.load %arg1[%c0] : memref<3xf32, #tpu.memory_space<smem>>
    %c1 = arith.constant 1 : index
    %1 = memref.load %arg1[%c1] : memref<3xf32, #tpu.memory_space<smem>>
    %c2 = arith.constant 2 : index
    %2 = memref.load %arg1[%c2] : memref<3xf32, #tpu.memory_space<smem>>
    %c0_0 = arith.constant 0 : index
    %c0_1 = arith.constant 0 : index
    %3 = vector.load %arg2[%c0_0, %c0_1] : memref<8x128xf32, #tpu.memory_space<vmem>>, vector<8x128xf32>
    %4 = vector.broadcast %0 : f32 to vector<8x128xf32>
    %5 = arith.mulf %3, %4 : vector<8x128xf32>
    %6 = vector.broadcast %1 : f32 to vector<8x128xf32>
    %7 = arith.addf %5, %6 : vector<8x128xf32>
    %cst = arith.constant 0.000000e+00 : f32
    %8 = vector.broadcast %cst : f32 to vector<8x128xf32>
    %9 = arith.cmpf ogt, %7, %8 : vector<8x128xf32>
    %10 = vector.broadcast %2 : f32 to vector<8x128xf32>
    %11 = arith.mulf %10, %7 : vector<8x128xf32>
    %12 = arith.select %9, %7, %11 : vector<8x128xi1>, vector<8x128xf32>
    %c0_2 = arith.constant 0 : index
    %c0_3 = arith.constant 0 : index
    %13 = vector.load %arg3[%c0_2, %c0_3] : memref<8x128xf32, #tpu.memory_space<vmem>>, vector<8x128xf32>
    tpu.vector_store %arg3[%c0_2, %c0_3], %12 {strides = array<i32>} : memref<8x128xf32, #tpu.memory_space<vmem>>, vector<8x128xf32>,
    return
  }
  func.func @transform_0(%arg0: i32, %arg1: memref<3xf32, #tpu.memory_space<smem>>) -> (i32, i32) {
    %c0_i32 = arith.constant 0 : i32
    %c0_i32_0 = arith.constant 0 : i32
    return %arg0, %c0_i32 : i32, i32
  }
  func.func @transform_1(%arg0: i32, %arg1: memref<3xf32, #tpu.memory_space<smem>>) -> (i32, i32) {
    %c0_i32 = arith.constant 0 : i32
    %c0_i32_0 = arith.constant 0 : i32
    return %arg0, %c0_i32 : i32, i32
  }
}

</mosaic_0001>

<bundles_post_ra>
// kernel: tpu_custom_call.1
= control target key start
LH: loop header
LB: loop body
LE: loop exit
PB: predicated region body
PF: predicated region fallthrough
CT: control target
= control target key end

     0   :  { %s133_s12 = smov [#allocation3]   ;;  %s160_s0 = inlined_call_operand.hbm [shape: f32[3], index: 0, kind: input, shape index: {}]   ;;  %s161_s1 = inlined_call_operand.hbm [shape: f32[8,128], index: 1, kind: input, shape index: {}]   ;;  %s162_s2 = inlined_call_operand.hbm [shape: f32[8,128], index: 2, kind: output, shape index: {}]  }
   0x1   :  { %s8_s11 = sshll.u32 %s160_s0, 4  ;;  %s9_s11 = int_to_ptr.hbm [resolvable:$true] %s8_s11 }
   0x2   :  { %11 = dma.hbm_to_smem %s9_s11, 16, %s133_s12, [#allocation2] }
   0x3   :  { %127 = dma.done.wait [#allocation2], 16 }
   0x4   :  { %128 = vsyncadd [#allocation2], 4294967280 }
   0x5   :  { %14 = sfence }
   0x6   :  { %15 = vsyncpa [#allocation5], 0 }
   0x7   :  { %16 = vsyncpa [#allocation6], 0  ;;  %s22_s15 = sshll.u32 %s161_s1, 4  ;;  %s134_s16 = smov [#allocation4]   ;;  %s23_s15 = int_to_ptr.hbm [resolvable:$true] %s22_s15 }
   0x8   :  { %s24_s17 = sshll.u32 %s134_s16, 4  ;;  %s25_s17 = int_to_ptr.vmem [resolvable:$true] %s24_s17 }
   0x9   :  { %27 = dma.hbm_to_vmem [thread:$0]  %s23_s15, 128, %s25_s17, [#allocation5]  }
   0xa   :  { %129 = dma.done.wait [#allocation5], 128  }
   0xb   :  { %130 = vsyncadd [#allocation5], 4294967168  ;;  %s32_s0 = sld [smem:[#allocation3]]  ;;  %v35_v0 = vld [vmem:[#allocation4] sm:$0xff]  ;;  %s135_s20 = smov [#allocation7]  }
   0xc   :  { %s62_s18 = sld [smem:[#allocation3 + $0x1]]  ;;  %s50_s21 = sshll.u32 %s135_s20, 4  ;;  %s51_s21 = int_to_ptr.vmem [resolvable:$true] %s50_s21 }
   0xd   :  { %s63_s19 = sld [smem:[#allocation3 + $0x2]]  ;;  %s52_s23 = sshll.u32 %s162_s2, 4  ;;  %s53_s23 = int_to_ptr.hbm [resolvable:$true] %s52_s23 }
  0x11   :  { %v36_v1 = vstv %s32_s0 }
  0x12   :  { %v37_v2 = vmul.f32 %v36_v1, %v35_v0  ;;  %v38_v3 = vstv %s62_s18 }
  0x13   :  { %v41_v4 = vstv %s63_s19 }
  0x14   :  { %v39_v5 = vadd.f32 %v38_v3, %v37_v2 }
  0x16   :  { %vm40_vm0 = vcmp.gt.f32.partialorder %v39_v5, 0.0  ;;  %v42_v6 = vmul.f32 %v41_v4, %v39_v5 }
  0x18   :  { %v43_v7 = vsel %vm40_vm0, %v39_v5, %v42_v6 }
  0x19   :  { %44 = vst [vmem:[#allocation7] sm:$0xff] %v43_v7 }
  0x1a   :  { %55 = dma.vmem_to_hbm [thread:$0]  %s51_s21, 128, %s53_s23, [#allocation6]  }
  0x1b   :  { %131 = dma.done.wait [#allocation6], 128  }
  0x1c   :  { %132 = vsyncadd [#allocation6], 4294967168 }
  0x1d   :  { %60 = vsyncpa [#allocation5], 1 }
  0x1e   :  { %61 = vsyncpa [#allocation6], 1 }

</bundles_post_ra>
